<compile_context>
chip_gen: v7x
topology: tpu7x:2x2x1
jax: 0.10.0
libtpu: 0.0.40
codegen_flags: <defaults>
</compile_context>

<pallas_src>
import functools

import jax
import jax.numpy as jnp
from jax import lax
from jax.experimental import pallas as pl
from jax.experimental.pallas import tpu as pltpu

_NEG_BIG = -1e30  # "minus infinity" that never produces inf-inf NaNs


def _kpt_fix_pn_kernel(cls_ref, x_ref, base_ref, bstat_ref, out_ref, *scratch,
                       n_ways, n_shots, n_base, omega, use_cosine):
    m_ref, l_ref, tgt_ref, best_ref = scratch[:4]
    xw_ref = scratch[4] if use_cosine else None

    N, D = x_ref.shape
    tile_c = base_ref.shape[0]
    dt = x_ref.dtype
    k = pl.program_id(0)

    def fold(logits, idx_row):
        """Online-LSE + running-argmax update with one (N, C_blk) logit block."""
        m_old = m_ref[...]                                               # (N, 1)
        blk_max = jnp.max(logits, axis=1, keepdims=True)                 # (N, 1)
        m_new = jnp.maximum(m_old, blk_max)
        l_ref[...] = (l_ref[...] * jnp.exp(m_old - m_new)
                      + jnp.sum(jnp.exp(logits - m_new), axis=1, keepdims=True))
        idx_f = jnp.broadcast_to(idx_row.astype(jnp.float32), logits.shape)
        blk_arg = jnp.min(jnp.where(logits >= blk_max, idx_f, 1e9),
                          axis=1, keepdims=True).astype(jnp.int32)       # first max
        best_ref[...] = jnp.where(blk_max > m_old, blk_arg, best_ref[...])
        m_ref[...] = m_new

    # ---- first grid step: init state + novel-prototype logits ---------------
    @pl.when(k == 0)
    def _():
        if use_cosine:
            xf = x_ref[...].astype(jnp.float32)
            inv = lax.rsqrt(jnp.maximum(jnp.sum(xf * xf, axis=1, keepdims=True),
                                        1e-24))
            xn = (xf * inv).astype(dt)
            xw_ref[...] = xn                       # reused by every base tile
        else:
            xn = x_ref[...]

        # Gram trick: G = x x^T; with onehot[i,c] = (cls[i] == c),
        #   H = G @ onehot  ->  H[i,c] = n_shots * x_i . novel_c
        #   sum_i onehot*H  ->  n_shots^2 * ||novel_c||^2   (row-oriented)
        G = lax.dot_general(xn, xn, (((1,), (1,)), ((), ())),
                            preferred_element_type=jnp.float32)          # (N, N)
        cls = cls_ref[...]                                               # (N, 1)
        onehot = (cls == lax.broadcasted_iota(jnp.int32, (N, n_ways), 1)
                  ).astype(jnp.float32)                                  # (N, n_ways)
        if n_shots == 1:
            H = G                                   # onehot == I, novel_c == x_c
        else:
            H = lax.dot_general(G, onehot, (((1,), (0,)), ((), ())),
                                preferred_element_type=jnp.float32)      # (N, n_ways)
        dotxp = H * (1.0 / n_shots)
        nsq = jnp.sum(onehot * H, axis=0, keepdims=True) * (
            1.0 / (n_shots * n_shots))                                   # (1, n_ways)
        if use_cosine:
            novel_logits = omega * (dotxp * lax.rsqrt(jnp.maximum(nsq, 1e-24)))
        else:
            novel_logits = omega * (2.0 * dotxp - nsq)

        tgt_ref[...] = jnp.sum(onehot * novel_logits, axis=1, keepdims=True)
        m_ref[...] = jnp.full((N, 1), _NEG_BIG, jnp.float32)
        l_ref[...] = jnp.zeros((N, 1), jnp.float32)
        best_ref[...] = jnp.zeros((N, 1), jnp.int32)
        fold(novel_logits, lax.broadcasted_iota(jnp.int32, (1, n_ways), 1))

    # ---- every grid step: one tile of base-class prototypes -----------------
    x_mm = xw_ref[...] if use_cosine else x_ref[...]
    xb = lax.dot_general(x_mm, base_ref[...], (((1,), (1,)), ((), ())),
                         preferred_element_type=jnp.float32)             # (N, tile_c)
    bstat = bstat_ref[...]                                               # (1, tile_c)
    if use_cosine:
        blk_logits = omega * (xb * bstat)           # bstat = 1 / ||b||
    else:
        blk_logits = omega * (2.0 * xb - bstat)     # bstat = ||b||^2
    idx_row = (n_ways + k * tile_c
               + lax.broadcasted_iota(jnp.int32, (1, tile_c), 1))
    if n_base % tile_c != 0:                        # static: mask the ragged tail
        blk_logits = jnp.where(idx_row < n_ways + n_base, blk_logits, _NEG_BIG)
    fold(blk_logits, idx_row)

    # ---- last grid step: finalize loss / accuracy ---------------------------
    @pl.when(k == pl.num_programs(0) - 1)
    def _():
        lse = m_ref[...] + jnp.log(l_ref[...])                           # (N, 1)
        loss = jnp.sum(lse - tgt_ref[...]) * (1.0 / N)
        acc = jnp.sum((best_ref[...] == cls_ref[...]).astype(jnp.float32)
                      ) * (1.0 / N)
        out_ref[0] = loss
        out_ref[1] = acc


def incremental_kpt_fix_pn_loss(prototypes, pt_labels, output, labels, *,
                                w=1.0, omega=1.0, n_shots=1, use_cosine=False,
                                base_stats=None, max_tile_classes=None):
    """JAX/Pallas equivalent of IncrementalKPTFixPNLoss.forward.

    `base_stats` (optional): precomputed ||b||^2 per base prototype (euclidean)
    or 1/||b|| (cosine); episode-invariant, so callers can cache it.
    """
    del pt_labels            # accepted but unused, exactly like the PyTorch module
    n_batch, d = output.shape
    n_base = prototypes.shape[0]
    n_ways = n_batch // n_shots
    dt = output.dtype
    if prototypes.dtype != dt:
        prototypes = prototypes.astype(dt)

    # Per-sample novel-class rank (== sorted_position // n_shots).  Loss / acc
    # are invariant to row permutations, so the (N, D) features are never
    # sorted/gathered; only this tiny int vector encodes the grouping.
    if n_shots == 1:
        cls_col = jnp.arange(n_batch, dtype=jnp.int32)
    else:
        smaller = jnp.sum((labels[None, :] < labels[:, None]).astype(jnp.int32),
                          axis=1)
        cls_col = (smaller // n_shots).astype(jnp.int32)
    cls_col = cls_col.reshape(n_batch, 1)

    # Episode-invariant base-prototype statistics.
    if base_stats is None:
        bsq = jnp.sum(prototypes.astype(jnp.float32) ** 2, axis=1)
        base_stats = lax.rsqrt(jnp.maximum(bsq, 1e-24)) if use_cosine else bsq
    base_stats = jnp.asarray(base_stats, jnp.float32).reshape(1, n_base)

    # ---- class-tile size over the base table --------------------------------
    itemsize = output.dtype.itemsize
    row_bytes = max(1, d * itemsize)
    auto_t = max(128, ((4 * 2 ** 20) // row_bytes) // 128 * 128)
    if max_tile_classes is not None:
        auto_t = min(auto_t, max(128, (int(max_tile_classes) // 128) * 128))
    tile_c = n_base if n_base <= auto_t else auto_t
    n_tiles = (n_base + tile_c - 1) // tile_c

    # ---- VMEM budget: operands + double buffers + f32 temporaries -----------
    resident = (n_batch * d * itemsize * (2 if use_cosine else 1)
                + 5 * n_batch * 4)
    per_tile = 2 * (tile_c * d * itemsize + tile_c * 4)          # 2x: dbl buffer
    temps = (3 * n_batch * tile_c * 4 + n_batch * n_batch * 4
             + 3 * n_batch * max(n_ways, 8) * 4)
    est = 2 * resident + 2 * per_tile + temps + (1 << 20)
    try:
        cap = int(getattr(pltpu.get_tpu_info(), "vmem_capacity_bytes",
                          64 * 2 ** 20))
    except Exception:
        cap = 64 * 2 ** 20
    vmem_limit = int(min(int(cap * 0.8), max(8 * 2 ** 20, est)))

    kernel = functools.partial(_kpt_fix_pn_kernel, n_ways=n_ways,
                               n_shots=n_shots, n_base=n_base,
                               omega=float(omega), use_cosine=bool(use_cosine))

    scratch = [pltpu.VMEM((n_batch, 1), jnp.float32),   # running max   m
               pltpu.VMEM((n_batch, 1), jnp.float32),   # running sum   l
               pltpu.VMEM((n_batch, 1), jnp.float32),   # target logit
               pltpu.VMEM((n_batch, 1), jnp.int32)]     # running argmax
    if use_cosine:
        scratch.append(pltpu.VMEM((n_batch, d), dt))    # normalized features

    grid_spec = pltpu.PrefetchScalarGridSpec(
        num_scalar_prefetch=0,
        grid=(n_tiles,),
        in_specs=[
            pl.BlockSpec((n_batch, 1), lambda k: (0, 0)),    # class ranks (resident)
            pl.BlockSpec((n_batch, d), lambda k: (0, 0)),    # features    (resident)
            pl.BlockSpec((tile_c, d), lambda k: (k, 0)),     # base-prototype tile
            pl.BlockSpec((1, tile_c), lambda k: (0, k)),     # base-stat tile
        ],
        out_specs=pl.BlockSpec(memory_space=pltpu.MemorySpace.SMEM),
        scratch_shapes=scratch,
    )

    loss_acc = pl.pallas_call(
        kernel,
        out_shape=jax.ShapeDtypeStruct((2,), jnp.float32),
        grid_spec=grid_spec,
        compiler_params=pltpu.CompilerParams(
            dimension_semantics=("arbitrary",),
            vmem_limit_bytes=vmem_limit),
    )(cls_col, output, prototypes, base_stats)

    loss = loss_acc[0]
    acc = loss_acc[1]
    log = {'PTFixPNLoss': loss, 'Acc': acc}
    return loss * w, log


def _reference_loss(prototypes, output, labels, *, omega, n_shots, use_cosine):
    """Pure-jnp transcription of the PyTorch module (self-check only)."""
    n_batch, _ = output.shape
    n_ways = n_batch // n_shots
    order = jnp.argsort(labels)
    x = output[order].astype(jnp.float32)
    p0 = prototypes.astype(jnp.float32)
    if use_cosine:
        x = x / jnp.maximum(jnp.linalg.norm(x, axis=1, keepdims=True), 1e-12)
    novel = x.reshape(n_ways, n_shots, -1).mean(axis=1)
    tgt = jnp.repeat(jnp.arange(n_ways), n_shots)
    p_all = jnp.concatenate([novel, p0], axis=0)
    if use_cosine:
        pn = p_all / jnp.maximum(jnp.linalg.norm(p_all, axis=1, keepdims=True), 1e-12)
        logits = -(1.0 - x @ pn.T) * omega
    else:
        d2 = (jnp.sum(x * x, axis=1, keepdims=True)
              + jnp.sum(p_all * p_all, axis=1)[None, :] - 2.0 * x @ p_all.T)
        logits = -d2 * omega
    m = jnp.max(logits, axis=1, keepdims=True)
    lse = m[:, 0] + jnp.log(jnp.sum(jnp.exp(logits - m), axis=1))
    loss = jnp.mean(lse - logits[jnp.arange(n_batch), tgt])
    acc = jnp.mean((jnp.argmax(logits, axis=1) == tgt).astype(jnp.float32))
    return loss, acc


if __name__ == "__main__":
    key = jax.random.PRNGKey(0)
    keys = jax.random.split(key, 10)

    def _close(a, b, tol=1e-3):
        a = float(a)
        b = float(b)
        return abs(a - b) <= tol * (1.0 + abs(b))

    def _run_case(kq, kp, kl, *, n_ways, n_shots, feat_dim, n_base, w, omega,
                  use_cosine, max_tile_classes=None):
        n_batch = n_ways * n_shots
        output = jax.random.normal(kq, (n_batch, feat_dim), dtype=jnp.float32)
        prototypes = jax.random.normal(kp, (n_base, feat_dim), dtype=jnp.float32)
        labels = jax.random.permutation(
            kl, jnp.repeat(jnp.arange(n_ways), n_shots))
        pt_labels = jnp.arange(n_base, dtype=jnp.int32)   # accepted but unused

        loss_w, log = incremental_kpt_fix_pn_loss(
            prototypes, pt_labels, output, labels,
            w=w, omega=omega, n_shots=n_shots, use_cosine=use_cosine,
            max_tile_classes=max_tile_classes)
        jax.block_until_ready((loss_w, log['PTFixPNLoss'], log['Acc']))
        ref_loss, ref_acc = _reference_loss(prototypes, output, labels,
                                            omega=omega, n_shots=n_shots,
                                            use_cosine=use_cosine)
        assert _close(log['PTFixPNLoss'], ref_loss), (
            float(log['PTFixPNLoss']), float(ref_loss))
        assert _close(log['Acc'], ref_acc), (float(log['Acc']), float(ref_acc))
        assert _close(loss_w, w * float(ref_loss)), (float(loss_w), float(ref_loss))

    # Case 1: squared-euclidean logits, 4-way 2-shot, 4 base classes (1 tile).
    _run_case(keys[0], keys[1], keys[2], n_ways=4, n_shots=2, feat_dim=32,
              n_base=4, w=0.5, omega=0.1, use_cosine=False)

    # Case 2: cosine logits, 6-way 1-shot, 5 base classes (1 tile).
    _run_case(keys[3], keys[4], keys[5], n_ways=6, n_shots=1, feat_dim=32,
              n_base=5, w=1.0, omega=4.0, use_cosine=True)

    # Case 3: cosine logits, 5-way 2-shot, 300 base classes, forced 128-class
    # tiles -> exercises the multi-tile online-LSE grid + ragged-tail masking.
    _run_case(keys[6], keys[7], keys[8], n_ways=5, n_shots=2, feat_dim=32,
              n_base=300, w=1.0, omega=2.0, use_cosine=True,
              max_tile_classes=128)

    print("KERNEL_OK")
</pallas_src>

<mosaic_0001>
module attributes {stable_mosaic.version = 11 : i64} {
  func.func @_kpt_fix_pn_kernel(%arg0: i32, %arg1: memref<8x1xi32, #tpu.memory_space<vmem>>, %arg2: memref<8x32xf32, #tpu.memory_space<vmem>>, %arg3: memref<4x32xf32, #tpu.memory_space<vmem>>, %arg4: memref<1x4xf32, #tpu.memory_space<vmem>>, %arg5: memref<2xf32, #tpu.memory_space<smem>>, %arg6: memref<8x1xf32, #tpu.memory_space<vmem>>, %arg7: memref<8x1xf32, #tpu.memory_space<vmem>>, %arg8: memref<8x1xf32, #tpu.memory_space<vmem>>, %arg9: memref<8x1xi32, #tpu.memory_space<vmem>>) attributes {dimension_semantics = [#tpu.dimension_semantics<arbitrary>], iteration_bounds = array<i64: 1>, scalar_prefetch = 0 : i64, scratch_operands = 4 : i64, tpu.core_type = #tpu.core_type<tc>, window_params = [{pipeline_mode = #tpu.pipeline_mode<synchronous>, transform_indices = @transform_0, window_bounds = array<i64: 8, 1>}, {pipeline_mode = #tpu.pipeline_mode<synchronous>, transform_indices = @transform_1, window_bounds = array<i64: 8, 32>}, {transform_indices = @transform_2, window_bounds = array<i64: 4, 32>}, {transform_indices = @transform_3, window_bounds = array<i64: 1, 4>}, {transform_indices = @transform_4, window_bounds = array<i64: 2>}]} {
    %c0_i32 = arith.constant 0 : i32
    %0 = arith.cmpi eq, %arg0, %c0_i32 : i32
    %1 = arith.extui %0 : i1 to i32
    %c0_i32_0 = arith.constant 0 : i32
    %2 = arith.cmpi ne, %1, %c0_i32_0 : i32
    scf.if %2 {
      %c0_27 = arith.constant 0 : index
      %c0_28 = arith.constant 0 : index
      %51 = vector.load %arg2[%c0_27, %c0_28] : memref<8x32xf32, #tpu.memory_space<vmem>>, vector<8x32xf32>
      %cst_29 = arith.constant dense<0.000000e+00> : vector<8x8xf32>
      %52 = tpu.matmul %51, %51, %cst_29 {dimension_numbers = #tpu.dot_dimension_numbers<[1], [1], [0], [0], [0, 0, 1, 0], [], []>} : vector<8x32xf32>, vector<8x32xf32>, vector<8x8xf32> -> vector<8x8xf32>
      %c0_30 = arith.constant 0 : index
      %c0_31 = arith.constant 0 : index
      %53 = vector.load %arg1[%c0_30, %c0_31] : memref<8x1xi32, #tpu.memory_space<vmem>>, vector<8x1xi32>
      %54 = tpu.iota {dimensions = array<i32: 1>} : vector<8x4xi32>
      %55 = vector.broadcast %53 : vector<8x1xi32> to vector<8x4xi32>
      %56 = arith.cmpi eq, %55, %54 : vector<8x4xi32>
      %57 = arith.extui %56 : vector<8x4xi1> to vector<8x4xi32>
      %58 = arith.sitofp %57 : vector<8x4xi32> to vector<8x4xf32>
      %cst_32 = arith.constant dense<0.000000e+00> : vector<8x4xf32>
      %59 = tpu.matmul %52, %58, %cst_32 {dimension_numbers = #tpu.dot_dimension_numbers<[1], [0], [0], [1], [0, 0, 1, 1], [], []>} : vector<8x8xf32>, vector<8x4xf32>, vector<8x4xf32> -> vector<8x4xf32>
      %cst_33 = arith.constant 5.000000e-01 : f32
      %60 = vector.broadcast %cst_33 : f32 to vector<8x4xf32>
      %61 = arith.mulf %59, %60 : vector<8x4xf32>
      %62 = arith.mulf %58, %59 : vector<8x4xf32>
      %cst_34 = arith.constant dense<0.000000e+00> : vector<4xf32>
      %63 = vector.multi_reduction <add>, %62, %cst_34 [0] : vector<8x4xf32> to vector<4xf32>
      %64 = vector.shape_cast %63 : vector<4xf32> to vector<1x4xf32>
      %cst_35 = arith.constant 2.500000e-01 : f32
      %65 = vector.broadcast %cst_35 : f32 to vector<1x4xf32>
      %66 = arith.mulf %64, %65 : vector<1x4xf32>
      %cst_36 = arith.constant 2.000000e+00 : f32
      %67 = vector.broadcast %cst_36 : f32 to vector<8x4xf32>
      %68 = arith.mulf %67, %61 : vector<8x4xf32>
      %69 = vector.broadcast %66 : vector<1x4xf32> to vector<8x4xf32>
      %70 = arith.subf %68, %69 : vector<8x4xf32>
      %cst_37 = arith.constant 1.000000e-01 : f32
      %71 = vector.broadcast %cst_37 : f32 to vector<8x4xf32>
      %72 = arith.mulf %71, %70 : vector<8x4xf32>
      %73 = arith.mulf %58, %72 : vector<8x4xf32>
      %cst_38 = arith.constant dense<0.000000e+00> : vector<8xf32>
      %74 = vector.multi_reduction <add>, %73, %cst_38 [1] : vector<8x4xf32> to vector<8xf32>
      %75 = vector.shape_cast %74 : vector<8xf32> to vector<8x1xf32>
      %c0_39 = arith.constant 0 : index
      %c0_40 = arith.constant 0 : index
      %76 = vector.load %arg8[%c0_39, %c0_40] : memref<8x1xf32, #tpu.memory_space<vmem>>, vector<8x1xf32>
      tpu.vector_store %arg8[%c0_39, %c0_40], %75 {strides = array<i32>} : memref<8x1xf32, #tpu.memory_space<vmem>>, vector<8x1xf32>,
      %cst_41 = arith.constant -1.000000e+30 : f32
      %77 = vector.broadcast %cst_41 : f32 to vector<8x1xf32>
      %c0_42 = arith.constant 0 : index
      %c0_43 = arith.constant 0 : index
      %78 = vector.load %arg6[%c0_42, %c0_43] : memref<8x1xf32, #tpu.memory_space<vmem>>, vector<8x1xf32>
      tpu.vector_store %arg6[%c0_42, %c0_43], %77 {strides = array<i32>} : memref<8x1xf32, #tpu.memory_space<vmem>>, vector<8x1xf32>,
      %cst_44 = arith.constant 0.000000e+00 : f32
      %79 = vector.broadcast %cst_44 : f32 to vector<8x1xf32>
      %c0_45 = arith.constant 0 : index
      %c0_46 = arith.constant 0 : index
      %80 = vector.load %arg7[%c0_45, %c0_46] : memref<8x1xf32, #tpu.memory_space<vmem>>, vector<8x1xf32>
      tpu.vector_store %arg7[%c0_45, %c0_46], %79 {strides = array<i32>} : memref<8x1xf32, #tpu.memory_space<vmem>>, vector<8x1xf32>,
      %c0_i32_47 = arith.constant 0 : i32
      %81 = vector.broadcast %c0_i32_47 : i32 to vector<8x1xi32>
      %c0_48 = arith.constant 0 : index
      %c0_49 = arith.constant 0 : index
      %82 = vector.load %arg9[%c0_48, %c0_49] : memref<8x1xi32, #tpu.memory_space<vmem>>, vector<8x1xi32>
      tpu.vector_store %arg9[%c0_48, %c0_49], %81 {strides = array<i32>} : memref<8x1xi32, #tpu.memory_space<vmem>>, vector<8x1xi32>,
      %83 = tpu.iota {dimensions = array<i32: 1>} : vector<1x4xi32>
      %c0_50 = arith.constant 0 : index
      %c0_51 = arith.constant 0 : index
      %84 = vector.load %arg6[%c0_50, %c0_51] : memref<8x1xf32, #tpu.memory_space<vmem>>, vector<8x1xf32>
      %cst_52 = arith.constant dense<0xFF800000> : vector<8xf32>
      %85 = vector.multi_reduction <maximumf>, %72, %cst_52 [1] : vector<8x4xf32> to vector<8xf32>
      %86 = vector.shape_cast %85 : vector<8xf32> to vector<8x1xf32>
      %87 = arith.maximumf %84, %86 : vector<8x1xf32>
      %c0_53 = arith.constant 0 : index
      %c0_54 = arith.constant 0 : index
      %88 = vector.load %arg7[%c0_53, %c0_54] : memref<8x1xf32, #tpu.memory_space<vmem>>, vector<8x1xf32>
      %89 = arith.subf %84, %87 : vector<8x1xf32>
      %90 = math.exp %89 : vector<8x1xf32>
      %91 = arith.mulf %88, %90 : vector<8x1xf32>
      %92 = vector.broadcast %87 : vector<8x1xf32> to vector<8x4xf32>
      %93 = arith.subf %72, %92 : vector<8x4xf32>
      %94 = math.exp %93 : vector<8x4xf32>
      %cst_55 = arith.constant dense<0.000000e+00> : vector<8xf32>
      %95 = vector.multi_reduction <add>, %94, %cst_55 [1] : vector<8x4xf32> to vector<8xf32>
      %96 = vector.shape_cast %95 : vector<8xf32> to vector<8x1xf32>
      %97 = arith.addf %91, %96 : vector<8x1xf32>
      %c0_56 = arith.constant 0 : index
      %c0_57 = arith.constant 0 : index
      %98 = vector.load %arg7[%c0_56, %c0_57] : memref<8x1xf32, #tpu.memory_space<vmem>>, vector<8x1xf32>
      tpu.vector_store %arg7[%c0_56, %c0_57], %97 {strides = array<i32>} : memref<8x1xf32, #tpu.memory_space<vmem>>, vector<8x1xf32>,
      %99 = arith.sitofp %83 : vector<1x4xi32> to vector<1x4xf32>
      %100 = vector.shape_cast %99 : vector<1x4xf32> to vector<1x4xf32>
      %101 = vector.broadcast %100 : vector<1x4xf32> to vector<8x4xf32>
      %102 = vector.broadcast %86 : vector<8x1xf32> to vector<8x4xf32>
      %103 = arith.cmpf oge, %72, %102 : vector<8x4xf32>
      %cst_58 = arith.constant 1.000000e+09 : f32
      %104 = vector.broadcast %cst_58 : f32 to vector<8x4xf32>
      %105 = arith.select %103, %101, %104 : vector<8x4xi1>, vector<8x4xf32>
      %cst_59 = arith.constant dense<0x7F800000> : vector<8xf32>
      %106 = vector.multi_reduction <minimumf>, %105, %cst_59 [1] : vector<8x4xf32> to vector<8xf32>
      %107 = vector.shape_cast %106 : vector<8xf32> to vector<8x1xf32>
      %108 = arith.fptosi %107 : vector<8x1xf32> to vector<8x1xi32>
      %109 = arith.cmpf ogt, %86, %84 : vector<8x1xf32>
      %c0_60 = arith.constant 0 : index
      %c0_61 = arith.constant 0 : index
      %110 = vector.load %arg9[%c0_60, %c0_61] : memref<8x1xi32, #tpu.memory_space<vmem>>, vector<8x1xi32>
      %111 = arith.select %109, %108, %110 : vector<8x1xi1>, vector<8x1xi32>
      %c0_62 = arith.constant 0 : index
      %c0_63 = arith.constant 0 : index
      %112 = vector.load %arg9[%c0_62, %c0_63] : memref<8x1xi32, #tpu.memory_space<vmem>>, vector<8x1xi32>
      tpu.vector_store %arg9[%c0_62, %c0_63], %111 {strides = array<i32>} : memref<8x1xi32, #tpu.memory_space<vmem>>, vector<8x1xi32>,
      %c0_64 = arith.constant 0 : index
      %c0_65 = arith.constant 0 : index
      %113 = vector.load %arg6[%c0_64, %c0_65] : memref<8x1xf32, #tpu.memory_space<vmem>>, vector<8x1xf32>
      tpu.vector_store %arg6[%c0_64, %c0_65], %87 {strides = array<i32>} : memref<8x1xf32, #tpu.memory_space<vmem>>, vector<8x1xf32>,
    } else {
    }
    %c0 = arith.constant 0 : index
    %c0_1 = arith.constant 0 : index
    %3 = vector.load %arg2[%c0, %c0_1] : memref<8x32xf32, #tpu.memory_space<vmem>>, vector<8x32xf32>
    %c0_2 = arith.constant 0 : index
    %c0_3 = arith.constant 0 : index
    %4 = vector.load %arg3[%c0_2, %c0_3] : memref<4x32xf32, #tpu.memory_space<vmem>>, vector<4x32xf32>
    %cst = arith.constant dense<0.000000e+00> : vector<8x4xf32>
    %5 = tpu.matmul %3, %4, %cst {dimension_numbers = #tpu.dot_dimension_numbers<[1], [1], [0], [0], [0, 0, 1, 0], [], []>} : vector<8x32xf32>, vector<4x32xf32>, vector<8x4xf32> -> vector<8x4xf32>
    %c0_4 = arith.constant 0 : index
    %c0_5 = arith.constant 0 : index
    %6 = vector.load %arg4[%c0_4, %c0_5] : memref<1x4xf32, #tpu.memory_space<vmem>>, vector<1x4xf32>
    %cst_6 = arith.constant 2.000000e+00 : f32
    %7 = vector.broadcast %cst_6 : f32 to vector<8x4xf32>
    %8 = arith.mulf %7, %5 : vector<8x4xf32>
    %9 = vector.broadcast %6 : vector<1x4xf32> to vector<8x4xf32>
    %10 = arith.subf %8, %9 : vector<8x4xf32>
    %cst_7 = arith.constant 1.000000e-01 : f32
    %11 = vector.broadcast %cst_7 : f32 to vector<8x4xf32>
    %12 = arith.mulf %11, %10 : vector<8x4xf32>
    %c4_i32 = arith.constant 4 : i32
    %13 = arith.muli %arg0, %c4_i32 : i32
    %c4_i32_8 = arith.constant 4 : i32
    %14 = arith.addi %c4_i32_8, %13 : i32
    %15 = tpu.iota {dimensions = array<i32: 1>} : vector<1x4xi32>
    %16 = vector.broadcast %14 : i32 to vector<1x4xi32>
    %17 = arith.addi %16, %15 : vector<1x4xi32>
    %c0_9 = arith.constant 0 : index
    %c0_10 = arith.constant 0 : index
    %18 = vector.load %arg6[%c0_9, %c0_10] : memref<8x1xf32, #tpu.memory_space<vmem>>, vector<8x1xf32>
    %cst_11 = arith.constant dense<0xFF800000> : vector<8xf32>
    %19 = vector.multi_reduction <maximumf>, %12, %cst_11 [1] : vector<8x4xf32> to vector<8xf32>
    %20 = vector.shape_cast %19 : vector<8xf32> to vector<8x1xf32>
    %21 = arith.maximumf %18, %20 : vector<8x1xf32>
    %c0_12 = arith.constant 0 : index
    %c0_13 = arith.constant 0 : index
    %22 = vector.load %arg7[%c0_12, %c0_13] : memref<8x1xf32, #tpu.memory_space<vmem>>, vector<8x1xf32>
    %23 = arith.subf %18, %21 : vector<8x1xf32>
    %24 = math.exp %23 : vector<8x1xf32>
    %25 = arith.mulf %22, %24 : vector<8x1xf32>
    %26 = vector.broadcast %21 : vector<8x1xf32> to vector<8x4xf32>
    %27 = arith.subf %12, %26 : vector<8x4xf32>
    %28 = math.exp %27 : vector<8x4xf32>
    %cst_14 = arith.constant dense<0.000000e+00> : vector<8xf32>
    %29 = vector.multi_reduction <add>, %28, %cst_14 [1] : vector<8x4xf32> to vector<8xf32>
    %30 = vector.shape_cast %29 : vector<8xf32> to vector<8x1xf32>
    %31 = arith.addf %25, %30 : vector<8x1xf32>
    %c0_15 = arith.constant 0 : index
    %c0_16 = arith.constant 0 : index
    %32 = vector.load %arg7[%c0_15, %c0_16] : memref<8x1xf32, #tpu.memory_space<vmem>>, vector<8x1xf32>
    tpu.vector_store %arg7[%c0_15, %c0_16], %31 {strides = array<i32>} : memref<8x1xf32, #tpu.memory_space<vmem>>, vector<8x1xf32>,
    %33 = arith.sitofp %17 : vector<1x4xi32> to vector<1x4xf32>
    %34 = vector.shape_cast %33 : vector<1x4xf32> to vector<1x4xf32>
    %35 = vector.broadcast %34 : vector<1x4xf32> to vector<8x4xf32>
    %36 = vector.broadcast %20 : vector<8x1xf32> to vector<8x4xf32>
    %37 = arith.cmpf oge, %12, %36 : vector<8x4xf32>
    %cst_17 = arith.constant 1.000000e+09 : f32
    %38 = vector.broadcast %cst_17 : f32 to vector<8x4xf32>
    %39 = arith.select %37, %35, %38 : vector<8x4xi1>, vector<8x4xf32>
    %cst_18 = arith.constant dense<0x7F800000> : vector<8xf32>
    %40 = vector.multi_reduction <minimumf>, %39, %cst_18 [1] : vector<8x4xf32> to vector<8xf32>
    %41 = vector.shape_cast %40 : vector<8xf32> to vector<8x1xf32>
    %42 = arith.fptosi %41 : vector<8x1xf32> to vector<8x1xi32>
    %43 = arith.cmpf ogt, %20, %18 : vector<8x1xf32>
    %c0_19 = arith.constant 0 : index
    %c0_20 = arith.constant 0 : index
    %44 = vector.load %arg9[%c0_19, %c0_20] : memref<8x1xi32, #tpu.memory_space<vmem>>, vector<8x1xi32>
    %45 = arith.select %43, %42, %44 : vector<8x1xi1>, vector<8x1xi32>
    %c0_21 = arith.constant 0 : index
    %c0_22 = arith.constant 0 : index
    %46 = vector.load %arg9[%c0_21, %c0_22] : memref<8x1xi32, #tpu.memory_space<vmem>>, vector<8x1xi32>
    tpu.vector_store %arg9[%c0_21, %c0_22], %45 {strides = array<i32>} : memref<8x1xi32, #tpu.memory_space<vmem>>, vector<8x1xi32>,
    %c0_23 = arith.constant 0 : index
    %c0_24 = arith.constant 0 : index
    %47 = vector.load %arg6[%c0_23, %c0_24] : memref<8x1xf32, #tpu.memory_space<vmem>>, vector<8x1xf32>
    tpu.vector_store %arg6[%c0_23, %c0_24], %21 {strides = array<i32>} : memref<8x1xf32, #tpu.memory_space<vmem>>, vector<8x1xf32>,
    %c0_i32_25 = arith.constant 0 : i32
    %48 = arith.cmpi eq, %arg0, %c0_i32_25 : i32
    %49 = arith.extui %48 : i1 to i32
    %c0_i32_26 = arith.constant 0 : i32
    %50 = arith.cmpi ne, %49, %c0_i32_26 : i32
    scf.if %50 {
      %c0_27 = arith.constant 0 : index
      %c0_28 = arith.constant 0 : index
      %51 = vector.load %arg6[%c0_27, %c0_28] : memref<8x1xf32, #tpu.memory_space<vmem>>, vector<8x1xf32>
      %c0_29 = arith.constant 0 : index
      %c0_30 = arith.constant 0 : index
      %52 = vector.load %arg7[%c0_29, %c0_30] : memref<8x1xf32, #tpu.memory_space<vmem>>, vector<8x1xf32>
      %53 = math.log %52 : vector<8x1xf32>
      %54 = arith.addf %51, %53 : vector<8x1xf32>
      %c0_31 = arith.constant 0 : index
      %c0_32 = arith.constant 0 : index
      %55 = vector.load %arg8[%c0_31, %c0_32] : memref<8x1xf32, #tpu.memory_space<vmem>>, vector<8x1xf32>
      %56 = arith.subf %54, %55 : vector<8x1xf32>
      %57 = vector.shape_cast %56 : vector<8x1xf32> to vector<1x8x1xf32>
      %cst_33 = arith.constant dense<0.000000e+00> : vector<1xf32>
      %58 = vector.multi_reduction <add>, %57, %cst_33 [1, 2] : vector<1x8x1xf32> to vector<1xf32>
      %59 = vector.shape_cast %58 : vector<1xf32> to vector<1x1x1xf32>
      %60 = vector.extract %59[0, 0, 0] : f32 from vector<1x1x1xf32>
      %cst_34 = arith.constant 1.250000e-01 : f32
      %61 = arith.mulf %60, %cst_34 : f32
      %c0_35 = arith.constant 0 : index
      %c0_36 = arith.constant 0 : index
      %62 = vector.load %arg9[%c0_35, %c0_36] : memref<8x1xi32, #tpu.memory_space<vmem>>, vector<8x1xi32>
      %c0_37 = arith.constant 0 : index
      %c0_38 = arith.constant 0 : index
      %63 = vector.load %arg1[%c0_37, %c0_38] : memref<8x1xi32, #tpu.memory_space<vmem>>, vector<8x1xi32>
      %64 = arith.cmpi eq, %62, %63 : vector<8x1xi32>
      %65 = arith.extui %64 : vector<8x1xi1> to vector<8x1xi32>
      %66 = arith.sitofp %65 : vector<8x1xi32> to vector<8x1xf32>
      %67 = vector.shape_cast %66 : vector<8x1xf32> to vector<1x8x1xf32>
      %cst_39 = arith.constant dense<0.000000e+00> : vector<1xf32>
      %68 = vector.multi_reduction <add>, %67, %cst_39 [1, 2] : vector<1x8x1xf32> to vector<1xf32>
      %69 = vector.shape_cast %68 : vector<1xf32> to vector<1x1x1xf32>
      %70 = vector.extract %69[0, 0, 0] : f32 from vector<1x1x1xf32>
      %cst_40 = arith.constant 1.250000e-01 : f32
      %71 = arith.mulf %70, %cst_40 : f32
      %c0_41 = arith.constant 0 : index
      %72 = memref.load %arg5[%c0_41] : memref<2xf32, #tpu.memory_space<smem>>
      memref.store %61, %arg5[%c0_41] : memref<2xf32, #tpu.memory_space<smem>>
      %c1 = arith.constant 1 : index
      %73 = memref.load %arg5[%c1] : memref<2xf32, #tpu.memory_space<smem>>
      memref.store %71, %arg5[%c1] : memref<2xf32, #tpu.memory_space<smem>>
    } else {
    }
    return
  }
  func.func @transform_0(%arg0: i32) -> (i32, i32) {
    %c0_i32 = arith.constant 0 : i32
    %c0_i32_0 = arith.constant 0 : i32
    %c0_i32_1 = arith.constant 0 : i32
    return %c0_i32, %c0_i32_0 : i32, i32
  }
  func.func @transform_1(%arg0: i32) -> (i32, i32) {
    %c0_i32 = arith.constant 0 : i32
    %c0_i32_0 = arith.constant 0 : i32
    %c0_i32_1 = arith.constant 0 : i32
    return %c0_i32, %c0_i32_0 : i32, i32
  }
  func.func @transform_2(%arg0: i32) -> (i32, i32) {
    %c0_i32 = arith.constant 0 : i32
    %c0_i32_0 = arith.constant 0 : i32
    return %arg0, %c0_i32 : i32, i32
  }
  func.func @transform_3(%arg0: i32) -> (i32, i32) {
    %c0_i32 = arith.constant 0 : i32
    %c0_i32_0 = arith.constant 0 : i32
    return %c0_i32, %arg0 : i32, i32
  }
  func.func @transform_4(%arg0: i32) -> i32 {
    %c0_i32 = arith.constant 0 : i32
    %c0_i32_0 = arith.constant 0 : i32
    return %c0_i32 : i32
  }
}

</mosaic_0001>

<bundles_post_ra>
// kernel: tpu_custom_call.1
= control target key start
LH: loop header
LB: loop body
LE: loop exit
PB: predicated region body
PF: predicated region fallthrough
CT: control target
= control target key end

     0   :  { %vm23_vm0 = vcmask 261120   ;;  %v492_v2 = vmov 0.0   ;;  %vm493_vm1 = vmmov 0   ;;  %vm198_vm2 = vcmask 7168   ;;  %s616_s0 = inlined_call_operand.vmem [shape: s32[8,1], index: 0, kind: input, shape index: {}]   ;;  %s617_s1 = inlined_call_operand.vmem [shape: f32[8,32], index: 1, kind: input, shape index: {}]   ;;  %s618_s2 = inlined_call_operand.vmem [shape: f32[4,32], index: 2, kind: input, shape index: {}]   ;;  %s619_s3 = inlined_call_operand.vmem [shape: f32[1,4], index: 3, kind: input, shape index: {}]   ;;  %s620_s4 = inlined_call_operand.hbm [shape: f32[2], index: 4, kind: output, shape index: {}]  }
   0x1   :  { %v22_v0 = vld [vmem:[%s617_s1] sm:$0xff]  ;;  %439 = vmatprep.subr.mxu0 %v492_v2  ;;  %441 = vmatprep.mubr.msk.f32.mxu0 %vm493_vm1, %v492_v2 }
   0x2   :  { %v529_v1 = vld [vmem:[%s616_s0] sm:$0xff] }
   0x3   :  { %9 = vsyncpa [#allocation7], 0  ;;  %440 = vmatpush3.xpose.msk.msra.mxu0 %vm23_vm0, %v22_v0  ;;  %v494_v3 = vmov 0   ;;  %201 = vst.msk [vmem:[#allocation3] sm:$0xff] %vm198_vm2, %v492_v2  ;;  %444 = vmatprep.subr.mxu1 %v492_v2  ;;  %v98_v4 = vlaneseq  ;;  %v495_v7 = vmov 1.0   ;;  %vm106_vm4 = vcmask 64512  }
   0x4   :  { %468 = vset.pattern.permute.xlu0 %v494_v3  ;;  %202 = vst.msk [vmem:[#allocation5] sm:$0xff] %vm198_vm2, %v494_v3  ;;  %446 = vmatprep.mubr.msk.f32.mxu1 %vm493_vm1, %v492_v2  ;;  %v239_v8 = vld [vmem:[%s618_s2] sm:$0xf]  ;;  %vm182_vm5 = vcmask 31744   ;;  %v496_v35 = vmov -1e+30  }
   0x5   :  { %101 = vperm.xlu0 %468, %v529_v1   ;;  %469 = vset.pattern.permute.xlu1 %v494_v3  ;;  %v543_v5 = vand.u32 127, %v98_v4  ;;  %v431_v18 = vld [vmem:[%s619_s3] ss:$0 sm:$0xff]  ;;  %200 = vst.msk [vmem:[#allocation2] sm:$0xff] %vm198_vm2, %v496_v35  ;;  %s480_s25 = scalar_lea.hbm %s620_s4, 16 }
   0x6   :  { %442 = vmatmul.mubr.msk.f32.vlgmr.msra.gmra.mrb[0].mxu0 %vm23_vm0, %v22_v0  ;;  %p481_p0 = scmp.ne.s32.totalorder %s620_s4, %s480_s25  ;;  %p484_p1 = scmp.lt.u32.totalorder %s480_s25, %s620_s4 }
   0x7   :  { %v226_v52 = vcvt.s32.f32 %v543_v5  ;;  %v332_v53 = vadd.s32 4, %v543_v5 }
   0x8   :  { %p486_p2 = pnand %p484_p1, %p481_p0 }
   0x9   :  { %v358_v57 = vcvt.s32.f32 %v332_v53 }
   0xa   :  { %v208_v4 = vld [vmem:[#allocation3] sm:$0xff] }
   0xc   :  { %v565_v36 = vld [vmem:[#allocation2] sm:$0xff] }
  0x84   :  { %v102_v6 = vpop.permute.xlu0 %101 }
  0x85   :  { %vm103_vm3 = vcmp.eq.s32.totalorder %v102_v6, %v543_v5 }
  0x86   :  { %445 = vmatpush3.msk.msra.mxu1 %vm103_vm3, %v495_v7  ;;  %v555_v11 = vsel %vm103_vm3, 1.0, %v492_v2 }
  0x87   :  { %449 = vmatprep.subr.mxu1 %v492_v2 }
  0xd9   :  { %v93_v9 = vpop.f32.mrb[0].mxu0 }
  0xda   :  { %v443_v10 = vpop.f32.mrb[1].mxu0  ;;  %447 = vmatmul.mubr.msk.f32.vlgmr.msra.gmra.mrb[0].mxu1 %vm106_vm4, %v93_v9 }
  0xdb   :  { %450 = vmatpush3.xpose.msk.msra.mxu1 %vm23_vm0, %v239_v8  ;;  %451 = vmatprep.mubr.msk.f32.mxu1 %vm493_vm1, %v492_v2 }
  0xde   :  { %452 = vmatmul.mubr.msk.f32.vlgmr.msra.gmra.mrb[2].mxu1 %vm23_vm0, %v22_v0 }
 0x1ad   :  { %v176_v12 = vpop.f32.mrb[0].mxu1 }
 0x1ae   :  { %v181_v13 = vmul.f32 %v555_v11, %v176_v12  ;;  %v448_v14 = vpop.f32.mrb[1].mxu1  ;;  %v180_v27 = vmul.f32 0.5, %v176_v12 }
 0x1b0   :  { %v183_v15 = vsel %vm182_vm5, %v181_v13, 0.0  ;;  %v191_v31 = vmul.f32 2.0, %v180_v27 }
 0x1b1   :  { %v184_v16 = vrot.slane %v183_v15, 4  ;;  %v313_v17 = vpop.f32.mrb[2].mxu1 }
 0x1b2   :  { %v318_v19 = vmul.f32 2.0, %v313_v17  ;;  %v453_v20 = vpop.f32.mrb[3].mxu1 }
 0x1b3   :  { %v185_v21 = vadd.f32 %v184_v16, %v183_v15  ;;  %v234_v15 = vld [vmem:[#allocation5] sm:$0xff] }
 0x1b4   :  { %v325_v22 = vsub.f32 %v318_v19, %v431_v18 }
 0x1b5   :  { %v186_v23 = vrot.slane %v185_v21, 2 }
 0x1b6   :  { %v326_v24 = vmul.f32 0.1, %v325_v22 }
 0x1b7   :  { %v187_v25 = vadd.f32 %v186_v23, %v185_v21 }
 0x1b8   :  { %v335_v26 = vsel %vm182_vm5, %v326_v24, -inf }
 0x1b9   :  { %v188_v28 = vrot.slane %v187_v25, 1  ;;  %336 = vmax.xlane.f32.xlu1 %v335_v26 }
 0x1bb   :  { %v189_v29 = vadd.f32 %v188_v28, %v187_v25 }
 0x1bd   :  { %v190_v30 = vmul.f32 0.25, %v189_v29 }
 0x1bf   :  { %v192_v32 = vsub.f32 %v191_v31, %v190_v30 }
 0x1c1   :  { %v193_v33 = vmul.f32 0.1, %v192_v32 }
 0x1c3   :  { %v204_v34 = vsel %vm182_vm5, %v193_v33, -inf  ;;  %v194_v61 = vmul.f32 %v555_v11, %v193_v33 }
 0x1c4   :  { %205 = vmax.xlane.f32.xlu0 %v204_v34 }
 0x1c5   :  { %v195_v62 = vsel %vm182_vm5, %v194_v61, 0.0 }
 0x246   :  { %v573_v40 = vpop.xlane.xlu1 %336 }
 0x247   :  { %vm359_vm7 = vcmp.ge.f32.partialorder %v326_v24, %v573_v40 }
 0x248   :  { %v360_v59 = vsel %vm359_vm7, %v358_v57, 1e+09 }
 0x249   :  { %v361_v60 = vsel %vm182_vm5, %v360_v59, inf }
 0x251   :  { %v567_v37 = vpop.xlane.xlu0 %205 }
 0x252   :  { %v207_v38 = vmax.f32 %v565_v36, %v567_v37  ;;  %vm227_vm6 = vcmp.ge.f32.partialorder %v193_v33, %v567_v37  ;;  %vm233_vm8 = vcmp.gt.f32.partialorder %v567_v37, %v565_v36 }
 0x253   :  { %v228_v56 = vsel %vm227_vm6, %v226_v52, 1e+09 }
 0x254   :  { %v209_v39 = vsub.f32 %v565_v36, %v207_v38  ;;  %237 = vst.msk [vmem:[#allocation2] sm:$0xff] %vm198_vm2, %v207_v38  ;;  %215 = vperm.xlu1 %469, %v207_v38   ;;  %v229_v58 = vsel %vm182_vm5, %v228_v56, inf }
 0x256   :  { %v210_v63 = vmul.f32 1.442695, %v209_v39 }
 0x25b   :  { %v575_v41 = vld [vmem:[#allocation2] sm:$0xff] }
 0x25c   :  { %v338_v42 = vmax.f32 %v575_v41, %v573_v40  ;;  %vm365_vm9 = vcmp.gt.f32.partialorder %v573_v40, %v575_v41 }
 0x25e   :  { %346 = vperm.xlu1 %469, %v338_v42   ;;  %v340_v43 = vsub.f32 %v575_v41, %v338_v42  ;;  %369 = vst.msk [vmem:[#allocation2] sm:$0xff] %vm198_vm2, %v338_v42 }
 0x260   :  { %v341_v3 = vmul.f32 1.442695, %v340_v43 }
 0x265   :  { %v373_v27 = vld [vmem:[#allocation2] sm:$0xff] }
 0x2d3   :  { %v216_v44 = vpop.permute.xlu1 %215 }
 0x2d4   :  { %v218_v45 = vsub.f32 %v193_v33, %v216_v44 }
 0x2d6   :  { %v219_v46 = vmul.f32 1.442695, %v218_v45 }
 0x2d8   :  { %470 = vpow2.f32 %v219_v46 }
 0x2dd   :  { %v347_v47 = vpop.permute.xlu1 %346 }
 0x2de   :  { %v349_v48 = vsub.f32 %v326_v24, %v347_v47 }
 0x2e0   :  { %v350_v49 = vmul.f32 1.442695, %v349_v48 }
 0x2e2   :  { %v471_v50 = vpop.eup %470  ;;  %472 = vpow2.f32 %v350_v49 }
 0x2e3   :  { %v221_v51 = vsel %vm182_vm5, %v471_v50, 0.0  ;;  %474 = vpow2.f32 %v210_v63 }
 0x2e4   :  { %222 = vadd.xlane.f32.xlu1 %v221_v51  ;;  %476 = vpow2.f32 %v341_v3 }
 0x2ec   :  { %v473_v54 = vpop.eup %472 }
 0x2ed   :  { %v352_v55 = vsel %vm182_vm5, %v473_v54, 0.0  ;;  %v475_v0 = vpop.eup %474 }
 0x2ee   :  { %353 = vadd.xlane.f32.xlu0 %v352_v55  ;;  %v212_v5 = vmul.f32 %v475_v0, %v208_v4  ;;  %v477_v8 = vpop.eup %476 }
 0x2f2   :  { %230 = vmin.xlane.f32.xlu0 %v229_v58 }
 0x2f6   :  { %362 = vmin.xlane.f32.xlu0 %v361_v60 }
 0x2fa   :  { %196 = vadd.xlane.f32.xlu0 %v195_v62 }
 0x371   :  { %v223_v6 = vpop.xlane.xlu1 %222 }
 0x372   :  { %v224_v7 = vadd.f32 %v223_v6, %v212_v5 }
 0x374   :  { %225 = vst.msk [vmem:[#allocation3] sm:$0xff] %vm198_vm2, %v224_v7 }
 0x37b   :  { %v354_v9 = vpop.xlane.xlu0 %353  ;;  %v339_v10 = vld [vmem:[#allocation3] sm:$0xff] }
 0x37c   :  { %v343_v12 = vmul.f32 %v477_v8, %v339_v10 }
 0x37e   :  { %v355_v11 = vadd.f32 %v354_v9, %v343_v12 }
 0x37f   :  { %v231_v13 = vpop.xlane.xlu0 %230 }
 0x380   :  { %357 = vst.msk [vmem:[#allocation3] sm:$0xff] %vm198_vm2, %v355_v11  ;;  %v454_v14 = vtrunc.f32 %v231_v13 }
 0x382   :  { %v455_v16 = vcvt.f32.s32 %v454_v14 }
 0x383   :  { %v363_v17 = vpop.xlane.xlu0 %362 }
 0x384   :  { %v235_v18 = vsel %vm233_vm8, %v455_v16, %v234_v15  ;;  %v456_v19 = vtrunc.f32 %v363_v17 }
 0x385   :  { %236 = vst.msk [vmem:[#allocation5] sm:$0xff] %vm198_vm2, %v235_v18 }
 0x386   :  { %v457_v22 = vcvt.f32.s32 %v456_v19 }
 0x387   :  { %v197_v20 = vpop.xlane.xlu0 %196  ;;  %v374_v21 = vld [vmem:[#allocation3] sm:$0xff] }
 0x388   :  { %199 = vst.msk [vmem:[#allocation4] sm:$0xff] %vm198_vm2, %v197_v20  ;;  %478 = vlog2.f32 %v374_v21 }
 0x38c   :  { %v366_v23 = vld [vmem:[#allocation5] sm:$0xff] }
 0x38d   :  { %v367_v24 = vsel %vm365_vm9, %v457_v22, %v366_v23 }
 0x38e   :  { %368 = vst.msk [vmem:[#allocation5] sm:$0xff] %vm198_vm2, %v367_v24 }
 0x38f   :  { %v378_v30 = vld [vmem:[#allocation4] sm:$0xff] }
 0x392   :  { %v479_v25 = vpop.eup %478 }
 0x393   :  { %v376_v26 = vmul.f32 0.6931472, %v479_v25 }
 0x395   :  { %v377_v28 = vadd.f32 %v376_v26, %v373_v27  ;;  %v391_v29 = vld [vmem:[#allocation5] sm:$0xff] }
 0x396   :  { %vm393_vm10 = vcmp.eq.s32.totalorder %v391_v29, %v529_v1 }
 0x397   :  { %v379_v31 = vsub.f32 %v377_v28, %v378_v30  ;;  %v432_v33 = vsel %vm393_vm10, 1.0, %v492_v2 }
 0x398   :  { %v396_v34 = vsel %vm198_vm2, %v432_v33, 0.0 }
 0x399   :  { %v380_v32 = vsel %vm198_vm2, %v379_v31, 0.0 }
 0x39a   :  { %381 = vadd.xlane.f32.xlu0 %v380_v32 }
 0x39e   :  { %397 = vadd.xlane.f32.xlu0 %v396_v34 }
 0x427   :  { %v382_v35 = vpop.xlane.xlu0 %381 }
 0x428   :  { %v383_v36 = vrot.slane %v382_v35, 4 }
 0x42a   :  { %v384_v37 = vadd.f32 %v383_v36, %v382_v35 }
 0x42b   :  { %v398_v38 = vpop.xlane.xlu0 %397 }
 0x42c   :  { %v385_v39 = vrot.slane %v384_v37, 2  ;;  %v399_v40 = vrot.slane %v398_v38, 4 }
 0x42e   :  { %v400_v41 = vadd.f32 %v399_v40, %v398_v38  ;;  %v386_v42 = vadd.f32 %v385_v39, %v384_v37 }
 0x430   :  { %v401_v43 = vrot.slane %v400_v41, 2  ;;  %v387_v44 = vrot.slane %v386_v42, 1 }
 0x432   :  { %v402_v45 = vadd.f32 %v401_v43, %v400_v41  ;;  %v388_v1 = vadd.f32 %v387_v44, %v386_v42 }
 0x434   :  { %458 = vpush %v388_v1  ;;  %v403_v46 = vrot.slane %v402_v45, 1 }
 0x436   :  { %v404_v47 = vadd.f32 %v403_v46, %v402_v45 }
 0x438   :  { %460 = vpush %v404_v47 }
 0x465   :  { %s459_s3 = spop %458 }
 0x466   :  { %s390_s20 = smul.f32 0.125, %s459_s3 }
 0x468   :  { %408 = sst [smem:[#allocation6]] %s390_s20 }
 0x469   :  { %s461_s21 = spop %460 }
 0x46a   :  { %s406_s22 = smul.f32 0.125, %s461_s21 }
 0x46c   :  { %410 = sst [smem:[#allocation6 + $0x1]] %s406_s22 }
 0x46d   :  { %489 = shalt.err (!%p486_p2)
}
 0x46e   :  { %s497_s30 = smov [#allocation6]  }
 0x46f   :  { %418 = dma.smem_to_hbm %s497_s30, 16, %s620_s4, [#allocation7]  }
 0x470   :  { %490 = dma.done.wait [#allocation7], 16  }
 0x471   :  { %491 = vsyncadd [#allocation7], 4294967280 }
 0x472   :  { %422 = sfence }
 0x473   :  { %423 = vsyncpa [#allocation7], 1 }

</bundles_post_ra>
